<compile_context>
chip_gen: v7x
topology: tpu7x:2x2x1
jax: 0.10.0
libtpu: 0.0.40
codegen_flags: <defaults>
</compile_context>

<pallas_src>
import jax
import jax.numpy as jnp
from jax.experimental import pallas as pl
from jax.experimental.pallas import tpu as pltpu


def _copy_kernel(x_ref, o_ref):
    # The entire YOLOLayer forward: y = x (elementwise pass-through).
    o_ref[...] = x_ref[...]


# --- tiling heuristics -------------------------------------------------------

_TARGET_BLOCK_BYTES = 1 << 20      # ~1 MiB block: amortizes per-step overhead,
                                   # double-buffered in+out stays well inside
                                   # the scoped-VMEM default on v5e/v6e/v7x.
_MAX_SINGLE_BLOCK_BYTES = 2 << 20  # whole-array-in-one-block threshold


def _sublane_granule(dtype):
    itemsize = jnp.dtype(dtype).itemsize
    if itemsize >= 4:
        return 8
    if itemsize == 2:
        return 16
    return 32


def _widest_lane(n):
    for cand in (2048, 1024, 512, 256, 128):
        if n % cand == 0:
            return cand
    return None


def _pick_block_rows(rows, lane, itemsize, granule):
    """Largest multiple of `granule` that divides `rows` with block <= ~1 MiB."""
    row_bytes = lane * itemsize
    cap = max(granule, (_TARGET_BLOCK_BYTES // row_bytes) // granule * granule)
    cand = min(rows, cap)
    cand -= cand % granule
    while cand >= granule:
        if rows % cand == 0:
            return cand
        cand -= granule
    return None


def _identity_copy_2d(x2d, block_rows):
    rows, lane = x2d.shape
    return pl.pallas_call(
        _copy_kernel,
        out_shape=jax.ShapeDtypeStruct((rows, lane), x2d.dtype),
        grid_spec=pltpu.PrefetchScalarGridSpec(
            num_scalar_prefetch=0,
            grid=(rows // block_rows,),
            in_specs=[pl.BlockSpec((block_rows, lane), lambda i: (i, 0))],
            out_specs=pl.BlockSpec((block_rows, lane), lambda i: (i, 0)),
        ),
        compiler_params=pltpu.CompilerParams(
            dimension_semantics=("parallel",),
        ),
    )(x2d)


def _identity_copy_batched(x):
    """Fallback for ragged shapes: block over the leading axis with all
    trailing dims full-extent (always layout-legal, no padding, no copies)."""
    lead = x.shape[0]
    rest = tuple(x.shape[1:])
    zeros = (0,) * len(rest)
    return pl.pallas_call(
        _copy_kernel,
        out_shape=jax.ShapeDtypeStruct(x.shape, x.dtype),
        grid_spec=pltpu.PrefetchScalarGridSpec(
            num_scalar_prefetch=0,
            grid=(lead,),
            in_specs=[pl.BlockSpec((1,) + rest, lambda i: (i,) + zeros)],
            out_specs=pl.BlockSpec((1,) + rest, lambda i: (i,) + zeros),
        ),
        compiler_params=pltpu.CompilerParams(
            dimension_semantics=("parallel",),
        ),
    )(x)


def yolo_layer_forward(x, anchors=None, num_classes=80, img_size=416):
    """Pallas implementation of YOLOLayer.forward (identity).

    anchors / num_classes / img_size are stored-only attributes in the
    reference module and do not affect the forward computation.
    """
    # TODO(synk): the zero-cost implementation is simply `return x` (or an
    # input_output_aliases no-op); the copy kernel is kept so the layer
    # exercises a real pallas_call.
    orig_shape = x.shape
    n = x.size
    if n == 0:
        return x
    itemsize = jnp.dtype(x.dtype).itemsize
    granule = _sublane_granule(x.dtype)

    lane = _widest_lane(n)
    if lane is not None:
        rows = n // lane
        x2d = x.reshape(rows, lane)  # free reshape of a contiguous array
        if rows % granule == 0:
            block_rows = _pick_block_rows(rows, lane, itemsize, granule)
            if block_rows is not None:
                return _identity_copy_2d(x2d, block_rows).reshape(orig_shape)
        if rows * lane * itemsize <= _MAX_SINGLE_BLOCK_BYTES:
            # Whole array as a single full-extent block (always legal).
            return _identity_copy_2d(x2d, rows).reshape(orig_shape)

    # Ragged / oddly-sized inputs: operate on the original shape, no padding.
    if x.ndim < 2:
        x2d = x.reshape(1, n)
        return _identity_copy_2d(x2d, 1).reshape(orig_shape)
    return _identity_copy_batched(x)


if __name__ == "__main__":
    key = jax.random.PRNGKey(0)

    # Small NCHW input consistent with a detection feature map.
    B, C, H, W = 2, 4, 16, 16
    x = jax.random.normal(key, (B, C, H, W), dtype=jnp.float32)

    # Deterministic "parameters" of the module (stored-only attributes).
    anchors = [(10, 13), (16, 30), (33, 23)]
    num_classes = 80
    img_size = 416

    y = yolo_layer_forward(x, anchors=anchors, num_classes=num_classes,
                           img_size=img_size)
    y = jax.block_until_ready(y)
    assert y.shape == x.shape and y.dtype == x.dtype
    assert bool(jnp.array_equal(y, x))

    # Also exercise the ragged fallback path (element count not a multiple of
    # 128) at a small shape typical of a YOLO head grid.
    x2 = jax.random.normal(jax.random.PRNGKey(1), (2, 3, 13, 13),
                           dtype=jnp.float32)
    y2 = jax.block_until_ready(yolo_layer_forward(x2, anchors=anchors))
    assert y2.shape == x2.shape and y2.dtype == x2.dtype
    assert bool(jnp.array_equal(y2, x2))

    print("KERNEL_OK")
</pallas_src>

<mosaic_0001>
module attributes {stable_mosaic.version = 11 : i64} {
  func.func @_copy_kernel(%arg0: i32, %arg1: memref<1x2048xf32, #tpu.memory_space<vmem>>, %arg2: memref<1x2048xf32, #tpu.memory_space<vmem>>) attributes {dimension_semantics = [#tpu.dimension_semantics<parallel>], iteration_bounds = array<i64: 1>, scalar_prefetch = 0 : i64, scratch_operands = 0 : i64, tpu.core_type = #tpu.core_type<tc>, window_params = [{transform_indices = @transform_0, window_bounds = array<i64: 1, 2048>}, {transform_indices = @transform_1, window_bounds = array<i64: 1, 2048>}]} {
    %c0 = arith.constant 0 : index
    %c0_0 = arith.constant 0 : index
    %0 = vector.load %arg1[%c0, %c0_0] : memref<1x2048xf32, #tpu.memory_space<vmem>>, vector<1x2048xf32>
    %c0_1 = arith.constant 0 : index
    %c0_2 = arith.constant 0 : index
    %1 = vector.load %arg2[%c0_1, %c0_2] : memref<1x2048xf32, #tpu.memory_space<vmem>>, vector<1x2048xf32>
    tpu.vector_store %arg2[%c0_1, %c0_2], %0 {strides = array<i32>} : memref<1x2048xf32, #tpu.memory_space<vmem>>, vector<1x2048xf32>,
    return
  }
  func.func @transform_0(%arg0: i32) -> (i32, i32) {
    %c0_i32 = arith.constant 0 : i32
    %c0_i32_0 = arith.constant 0 : i32
    return %arg0, %c0_i32 : i32, i32
  }
  func.func @transform_1(%arg0: i32) -> (i32, i32) {
    %c0_i32 = arith.constant 0 : i32
    %c0_i32_0 = arith.constant 0 : i32
    return %arg0, %c0_i32 : i32, i32
  }
}

</mosaic_0001>

<bundles_post_ra>
// kernel: tpu_custom_call.1
= control target key start
LH: loop header
LB: loop body
LE: loop exit
PB: predicated region body
PF: predicated region fallthrough
CT: control target
= control target key end

     0   :  { %6 = vsyncpa [#allocation3], 0  ;;  %s126_s0 = inlined_call_operand.hbm [shape: f32[1,2048], index: 0, kind: input, shape index: {}]   ;;  %s127_s1 = inlined_call_operand.hbm [shape: f32[1,2048], index: 1, kind: output, shape index: {}]  }
   0x1   :  { %7 = vsyncpa [#allocation4], 0  ;;  %s90_s6 = smov [#allocation2]   ;;  %s42_s10 = scalar_lea.hbm %s126_s0, 256 }
   0x2   :  { %s14_s7 = sshll.u32 %s90_s6, 4  ;;  %p43_p0 = scmp.ne.s32.totalorder %s126_s0, %s42_s10  ;;  %s15_s7 = int_to_ptr.vmem [resolvable:$true] %s14_s7 }
   0x3   :  { %p46_p1 = scmp.lt.u32.totalorder %s42_s10, %s126_s0 }
   0x5   :  { %p48_p2 = pnand %p46_p1, %p43_p0 }
   0x7   :  { %51 = shalt.err (!%p48_p2)
}
   0x8   :  { %s52_s15 = scalar_lea.vmem %s15_s7, 256  ;;  %p57_p4 = scmp.lt.s32.totalorder %s15_s7, %s15_s7 }
   0x9   :  { %p53_p3 = scmp.ne.s32.totalorder %s15_s7, %s52_s15  ;;  %p58_p5 = scmp.lt.s32.totalorder %s52_s15, %s52_s15 }
   0xb   :  { %p59_p6 = por %p58_p5, %p57_p4 }
   0xd   :  { %p60_p7 = pnand %p59_p6, %p53_p3 }
   0xf   :  { %63 = shalt.err (!%p60_p7)
}
  0x10   :  { %17 = dma.hbm_to_vmem [thread:$0]  %s126_s0, 256, %s15_s7, [#allocation3]  }
  0x11   :  { %86 = dma.done.wait [#allocation3], 256  }
  0x12   :  { %87 = vsyncadd [#allocation3], 4294967040  ;;  %s91_s18 = smov [#allocation5]   ;;  %v21_v0 = vld [vmem:[#allocation2] sm:$0xff]  ;;  %v22_v1 = vld [vmem:[#allocation2 + $0x8] sm:$0xff] }
  0x13   :  { %s31_s19 = sshll.u32 %s91_s18, 4  ;;  %23 = vst [vmem:[#allocation5] sm:$0xff] %v21_v0  ;;  %24 = vst [vmem:[#allocation5 + $0x8] sm:$0xff] %v22_v1  ;;  %s32_s19 = int_to_ptr.vmem [resolvable:$true] %s31_s19 }
  0x14   :  { %s64_s20 = scalar_lea.vmem %s32_s19, 256  ;;  %p69_p9 = scmp.lt.s32.totalorder %s32_s19, %s32_s19 }
  0x15   :  { %p65_p8 = scmp.ne.s32.totalorder %s32_s19, %s64_s20  ;;  %p70_p10 = scmp.lt.s32.totalorder %s64_s20, %s64_s20 }
  0x17   :  { %p71_p11 = por %p70_p10, %p69_p9 }
  0x19   :  { %p72_p12 = pnand %p71_p11, %p65_p8 }
  0x1b   :  { %75 = shalt.err (!%p72_p12)
}
  0x1c   :  { %s76_s0 = scalar_lea.hbm %s127_s1, 256 }
  0x1d   :  { %p77_p13 = scmp.ne.s32.totalorder %s127_s1, %s76_s0  ;;  %p80_p0 = scmp.lt.u32.totalorder %s76_s0, %s127_s1 }
  0x1f   :  { %p82_p1 = pnand %p80_p0, %p77_p13 }
  0x21   :  { %85 = shalt.err (!%p82_p1)
}
  0x22   :  { %34 = dma.vmem_to_hbm [thread:$0]  %s32_s19, 256, %s127_s1, [#allocation4]  }
  0x23   :  { %88 = dma.done.wait [#allocation4], 256  }
  0x24   :  { %89 = vsyncadd [#allocation4], 4294967040 }
  0x25   :  { %38 = vsyncpa [#allocation3], 1 }
  0x26   :  { %39 = vsyncpa [#allocation4], 1 }

</bundles_post_ra>
